<compile_context>
chip_gen: v7x
topology: tpu7x:2x2x1
jax: 0.10.0
libtpu: 0.0.40
codegen_flags: <defaults>
</compile_context>

<pallas_src>
import jax
import jax.numpy as jnp
from jax.experimental import pallas as pl
from jax.experimental.pallas import tpu as pltpu

FP8_MAX = 448.0          # max finite value of float8_e4m3fn
FP8_INV = 1.0 / FP8_MAX
EPS = 1e-6               # RMSNorm eps
SCALE_MIN = 1e-12        # floor on the dynamic per-token scale (guards all-zero rows)


def _device_kind():
    try:
        return jax.devices()[0].device_kind.lower()
    except Exception:
        return ""


def _round_up(v, m):
    return (v + m - 1) // m * m


def _rmsnorm(v, g, eps):
    # vLLM RMSNorm: v * rsqrt(mean(v^2, -1) + eps) * weight   (all f32 on the VPU/EUP)
    var = jnp.mean(v * v, axis=-1, keepdims=True)
    return v * jax.lax.rsqrt(var + eps) * g


def _fp8_linear_dynamic(y, w, wscale, act_dtype):
    # Fp8LinearOp.apply with input_scale=None, use_per_token_if_dynamic=True:
    #   per-token scale s = max|y| / fp8_max ; q = quantize(y / s) ;
    #   out = (q @ w) * s * wscale
    amax = jnp.max(jnp.abs(y), axis=-1, keepdims=True)            # [rows, 1]
    s = jnp.maximum(amax * FP8_INV, SCALE_MIN)
    inv_s = 1.0 / s                                                # [rows, 1]: cheap, exact
    q = jnp.clip(y * inv_s, -FP8_MAX, FP8_MAX).astype(act_dtype)
    out = jnp.dot(q, w, preferred_element_type=jnp.float32)
    return out * (s * wscale)                                      # wscale folded into row scale


def _forward_rows(x, g0, g1, g2, w0, w1, ws0, ws1, act_dtype):
    resid = jnp.sqrt(x)
    y = _rmsnorm(x, g0, EPS)                       # norm[0](x)
    x2 = _fp8_linear_dynamic(y, w0, ws0, act_dtype)
    resid = x2 + resid                             # norm[1](x2, resid)
    y2 = _rmsnorm(resid, g1, EPS)
    x3 = _fp8_linear_dynamic(y2, w1, ws1, act_dtype)
    resid = x3 + resid                             # norm[2](x3, resid)
    return _rmsnorm(resid, g2, EPS)


def _make_kernel(act_dtype):
    def fused_kernel(x_ref, g_ref, w0_ref, w1_ref, ws_ref, o_ref):
        g0 = g_ref[0:1, :]
        g1 = g_ref[1:2, :]
        g2 = g_ref[2:3, :]
        ws0 = ws_ref[0]
        ws1 = ws_ref[1]
        w0 = w0_ref[...]
        w1 = w1_ref[...]
        tile_t, h = x_ref.shape

        # At small/medium H the VPU/XLU phase (norm + abs-max + quant) is the binding
        # slot: split the tile into 2 row-independent sub-blocks so sub-block B's VPU
        # work overlaps sub-block A's MXU matmuls.  At large H the MXU dominates and
        # the split is skipped.
        if h <= 512 and tile_t >= 16 and tile_t % 16 == 0:
            half = tile_t // 2
            o_ref[0:half, :] = _forward_rows(
                x_ref[0:half, :], g0, g1, g2, w0, w1, ws0, ws1, act_dtype)
            o_ref[half:tile_t, :] = _forward_rows(
                x_ref[half:tile_t, :], g0, g1, g2, w0, w1, ws0, ws1, act_dtype)
        else:
            o_ref[...] = _forward_rows(
                x_ref[...], g0, g1, g2, w0, w1, ws0, ws1, act_dtype)

    return fused_kernel


def _pick_token_tile(T, H, w_bytes, kind):
    # Big tiles amortize the ~0.35us/step overhead and feed the 256-deep MXU;
    # a partial last block is masked on writeback (all ops are row-independent),
    # so T does NOT need to divide evenly.
    if "v5" in kind:
        cap, budget = 128, 100 * 2**20      # 4x128 MXU fills at 128 rows
    elif "v7" in kind:
        cap, budget = 256, 48 * 2**20       # only 64 MiB VMEM per TensorCore
    else:                                   # v6e / unknown
        cap, budget = 512, 100 * 2**20

    if T <= cap:
        tile = T
        if "v7" in kind and T >= 16:
            # 2 TensorCores per chip: give the "parallel" token grid >= 2 steps.
            tile = min(T, _round_up(pl.cdiv(T, 2), 8))
    else:
        tile = cap

    resident = 2 * H * H * w_bytes + 3 * H * 4   # single-buffered weights + gammas
    # shrink until resident weights + double-buffered x/out tiles fit the budget
    while tile > 8 and resident + 4 * tile * H * 4 > budget:
        tile = max(8, _round_up(tile // 2, 8))
    return tile


def test_model_forward(x, g, w0_fp8_t, w1_fp8_t, wscales):
    T, H = x.shape
    kind = _device_kind()

    # Native fp8 MXU only on v7x; v5e/v6e MXUs are bf16 (e4m3 values are exactly
    # representable in bf16, so the weight roundtrip adds no error there).
    use_native_fp8 = "v7" in kind
    mxu_dtype = jnp.float8_e4m3fn if use_native_fp8 else jnp.bfloat16
    w_bytes = 1 if use_native_fp8 else 2
    w0 = w0_fp8_t.astype(mxu_dtype)
    w1 = w1_fp8_t.astype(mxu_dtype)

    tile_t = _pick_token_tile(T, H, w_bytes, kind)
    grid = (pl.cdiv(T, tile_t),)

    resident = 2 * H * H * w_bytes + 3 * H * 4
    needed = resident + 4 * tile_t * H * 4 + (4 << 20)
    phys_cap = (56 << 20) if "v7" in kind else (112 << 20)
    vmem_limit = int(min(max(needed, 32 << 20), phys_cap))

    cost = pl.CostEstimate(
        flops=2 * 2 * T * H * H + 30 * T * H,            # 2 matmuls + elementwise
        transcendentals=T * H + 3 * T,                   # sqrt(x) + 3 rsqrt per token
        bytes_accessed=2 * T * H * 4 + 2 * H * H * w_bytes + 3 * H * 4 + 2 * 4,
    )

    kernel = _make_kernel(mxu_dtype)

    return pl.pallas_call(
        kernel,
        out_shape=jax.ShapeDtypeStruct((T, H), jnp.float32),
        grid=grid,
        in_specs=[
            pl.BlockSpec((tile_t, H), lambda i: (i, 0)),                        # x  [T,H] f32
            pl.BlockSpec((3, H), lambda i: (0, 0),
                         pipeline_mode=pl.Buffered(1)),                         # gammas (resident)
            pl.BlockSpec((H, H), lambda i: (0, 0),
                         pipeline_mode=pl.Buffered(1)),                         # w0 (resident)
            pl.BlockSpec((H, H), lambda i: (0, 0),
                         pipeline_mode=pl.Buffered(1)),                         # w1 (resident)
            pl.BlockSpec(memory_space=pltpu.MemorySpace.SMEM),                  # wscales [2] f32
        ],
        out_specs=pl.BlockSpec((tile_t, H), lambda i: (i, 0)),
        compiler_params=pltpu.CompilerParams(
            dimension_semantics=("parallel",),
            vmem_limit_bytes=vmem_limit,
        ),
        cost_estimate=cost,
    )(x, g, w0, w1, wscales)


if __name__ == "__main__":
    T, H = 16, 128   # tokens, hidden_size

    key = jax.random.PRNGKey(0)
    k_x, k_w0, k_w1, k_ws = jax.random.split(key, 4)

    # Input (torch.rand-like: uniform [0,1), so sqrt(x) is real)
    x = jax.random.uniform(k_x, (T, H), dtype=jnp.float32)

    # Weights: rand(H, H) -> fp8 (e4m3fn) -> .t().  Transpose before the elementwise
    # quantize (identical result) so the transposed weight is materialized contiguously.
    w0_fp8_t = jax.random.uniform(k_w0, (H, H), dtype=jnp.float32).T.astype(jnp.float8_e4m3fn)
    w1_fp8_t = jax.random.uniform(k_w1, (H, H), dtype=jnp.float32).T.astype(jnp.float8_e4m3fn)

    # Per-layer weight scales (torch.rand(1) each)
    wscales = jax.random.uniform(k_ws, (2,), dtype=jnp.float32)

    # RMSNorm weights initialize to ones in vLLM
    g = jnp.ones((3, H), dtype=jnp.float32)

    out = test_model_forward(x, g, w0_fp8_t, w1_fp8_t, wscales)
    jax.block_until_ready(out)
    assert out.shape == (T, H) and out.dtype == jnp.float32
    assert bool(jnp.all(jnp.isfinite(out)))
    print("KERNEL_OK")
</pallas_src>

<mosaic_0001>
module attributes {stable_mosaic.version = 11 : i64} {
  func.func @fused_kernel(%arg0: i32, %arg1: memref<16x128xf32, #tpu.memory_space<vmem>>, %arg2: memref<3x128xf32, #tpu.memory_space<vmem>>, %arg3: memref<128x128xbf16, #tpu.memory_space<vmem>>, %arg4: memref<128x128xbf16, #tpu.memory_space<vmem>>, %arg5: memref<2xf32, #tpu.memory_space<smem>>, %arg6: memref<16x128xf32, #tpu.memory_space<vmem>>) attributes {dimension_semantics = [#tpu.dimension_semantics<parallel>], iteration_bounds = array<i64: 1>, scalar_prefetch = 0 : i64, scratch_operands = 0 : i64, tpu.core_type = #tpu.core_type<tc>, window_params = [{transform_indices = @transform_0, window_bounds = array<i64: 16, 128>}, {pipeline_mode = #tpu.pipeline_mode<synchronous>, transform_indices = @transform_1, window_bounds = array<i64: 3, 128>}, {pipeline_mode = #tpu.pipeline_mode<synchronous>, transform_indices = @transform_2, window_bounds = array<i64: 128, 128>}, {pipeline_mode = #tpu.pipeline_mode<synchronous>, transform_indices = @transform_3, window_bounds = array<i64: 128, 128>}, {transform_indices = @transform_4, window_bounds = array<i64: 2>}, {transform_indices = @transform_5, window_bounds = array<i64: 16, 128>}]} {
    %c0 = arith.constant 0 : index
    %c0_0 = arith.constant 0 : index
    %0 = vector.load %arg2[%c0, %c0_0] : memref<3x128xf32, #tpu.memory_space<vmem>>, vector<1x128xf32>
    %c1 = arith.constant 1 : index
    %c0_1 = arith.constant 0 : index
    %1 = vector.load %arg2[%c1, %c0_1] : memref<3x128xf32, #tpu.memory_space<vmem>>, vector<1x128xf32>
    %c2 = arith.constant 2 : index
    %c0_2 = arith.constant 0 : index
    %2 = vector.load %arg2[%c2, %c0_2] : memref<3x128xf32, #tpu.memory_space<vmem>>, vector<1x128xf32>
    %c0_3 = arith.constant 0 : index
    %3 = memref.load %arg5[%c0_3] : memref<2xf32, #tpu.memory_space<smem>>
    %c1_4 = arith.constant 1 : index
    %4 = memref.load %arg5[%c1_4] : memref<2xf32, #tpu.memory_space<smem>>
    %c0_5 = arith.constant 0 : index
    %c0_6 = arith.constant 0 : index
    %5 = vector.load %arg3[%c0_5, %c0_6] : memref<128x128xbf16, #tpu.memory_space<vmem>>, vector<128x128xbf16>
    %c0_7 = arith.constant 0 : index
    %c0_8 = arith.constant 0 : index
    %6 = vector.load %arg4[%c0_7, %c0_8] : memref<128x128xbf16, #tpu.memory_space<vmem>>, vector<128x128xbf16>
    %c0_9 = arith.constant 0 : index
    %c0_10 = arith.constant 0 : index
    %7 = vector.load %arg1[%c0_9, %c0_10] : memref<16x128xf32, #tpu.memory_space<vmem>>, vector<8x128xf32>
    %8 = math.sqrt %7 : vector<8x128xf32>
    %9 = arith.mulf %7, %7 : vector<8x128xf32>
    %cst = arith.constant dense<0.000000e+00> : vector<8xf32>
    %10 = vector.multi_reduction <add>, %9, %cst [1] : vector<8x128xf32> to vector<8xf32>
    %11 = vector.shape_cast %10 : vector<8xf32> to vector<8x1xf32>
    %cst_11 = arith.constant 1.280000e+02 : f32
    %12 = vector.broadcast %cst_11 : f32 to vector<8x1xf32>
    %13 = arith.divf %11, %12 : vector<8x1xf32>
    %cst_12 = arith.constant 9.99999997E-7 : f32
    %14 = vector.broadcast %cst_12 : f32 to vector<8x1xf32>
    %15 = arith.addf %13, %14 : vector<8x1xf32>
    %16 = math.rsqrt %15 : vector<8x1xf32>
    %17 = vector.broadcast %16 : vector<8x1xf32> to vector<8x128xf32>
    %18 = arith.mulf %7, %17 : vector<8x128xf32>
    %19 = vector.broadcast %0 : vector<1x128xf32> to vector<8x128xf32>
    %20 = arith.mulf %18, %19 : vector<8x128xf32>
    %21 = math.absf %20 : vector<8x128xf32>
    %cst_13 = arith.constant dense<0xFF800000> : vector<8xf32>
    %22 = vector.multi_reduction <maximumf>, %21, %cst_13 [1] : vector<8x128xf32> to vector<8xf32>
    %23 = vector.shape_cast %22 : vector<8xf32> to vector<8x1xf32>
    %cst_14 = arith.constant 0.00223214296 : f32
    %24 = vector.broadcast %cst_14 : f32 to vector<8x1xf32>
    %25 = arith.mulf %23, %24 : vector<8x1xf32>
    %cst_15 = arith.constant 9.99999996E-13 : f32
    %26 = vector.broadcast %cst_15 : f32 to vector<8x1xf32>
    %27 = arith.maximumf %25, %26 : vector<8x1xf32>
    %cst_16 = arith.constant 1.000000e+00 : f32
    %28 = vector.broadcast %cst_16 : f32 to vector<8x1xf32>
    %29 = arith.divf %28, %27 : vector<8x1xf32>
    %30 = vector.broadcast %29 : vector<8x1xf32> to vector<8x128xf32>
    %31 = arith.mulf %20, %30 : vector<8x128xf32>
    %cst_17 = arith.constant -4.480000e+02 : f32
    %cst_18 = arith.constant 4.480000e+02 : f32
    %32 = vector.broadcast %cst_17 : f32 to vector<8x128xf32>
    %33 = arith.maximumf %32, %31 : vector<8x128xf32>
    %34 = vector.broadcast %cst_18 : f32 to vector<8x128xf32>
    %35 = arith.minimumf %34, %33 : vector<8x128xf32>
    %36 = arith.truncf %35 : vector<8x128xf32> to vector<8x128xbf16>
    %cst_19 = arith.constant dense<0.000000e+00> : vector<8x128xf32>
    %37 = tpu.matmul %36, %5, %cst_19 {dimension_numbers = #tpu.dot_dimension_numbers<[1], [0], [0], [1], [0, 0, 1, 1], [], []>} : vector<8x128xbf16>, vector<128x128xbf16>, vector<8x128xf32> -> vector<8x128xf32>
    %38 = vector.broadcast %3 : f32 to vector<8x1xf32>
    %39 = arith.mulf %27, %38 : vector<8x1xf32>
    %40 = vector.broadcast %39 : vector<8x1xf32> to vector<8x128xf32>
    %41 = arith.mulf %37, %40 : vector<8x128xf32>
    %42 = arith.addf %41, %8 : vector<8x128xf32>
    %43 = arith.mulf %42, %42 : vector<8x128xf32>
    %cst_20 = arith.constant dense<0.000000e+00> : vector<8xf32>
    %44 = vector.multi_reduction <add>, %43, %cst_20 [1] : vector<8x128xf32> to vector<8xf32>
    %45 = vector.shape_cast %44 : vector<8xf32> to vector<8x1xf32>
    %cst_21 = arith.constant 1.280000e+02 : f32
    %46 = vector.broadcast %cst_21 : f32 to vector<8x1xf32>
    %47 = arith.divf %45, %46 : vector<8x1xf32>
    %cst_22 = arith.constant 9.99999997E-7 : f32
    %48 = vector.broadcast %cst_22 : f32 to vector<8x1xf32>
    %49 = arith.addf %47, %48 : vector<8x1xf32>
    %50 = math.rsqrt %49 : vector<8x1xf32>
    %51 = vector.broadcast %50 : vector<8x1xf32> to vector<8x128xf32>
    %52 = arith.mulf %42, %51 : vector<8x128xf32>
    %53 = vector.broadcast %1 : vector<1x128xf32> to vector<8x128xf32>
    %54 = arith.mulf %52, %53 : vector<8x128xf32>
    %55 = math.absf %54 : vector<8x128xf32>
    %cst_23 = arith.constant dense<0xFF800000> : vector<8xf32>
    %56 = vector.multi_reduction <maximumf>, %55, %cst_23 [1] : vector<8x128xf32> to vector<8xf32>
    %57 = vector.shape_cast %56 : vector<8xf32> to vector<8x1xf32>
    %cst_24 = arith.constant 0.00223214296 : f32
    %58 = vector.broadcast %cst_24 : f32 to vector<8x1xf32>
    %59 = arith.mulf %57, %58 : vector<8x1xf32>
    %cst_25 = arith.constant 9.99999996E-13 : f32
    %60 = vector.broadcast %cst_25 : f32 to vector<8x1xf32>
    %61 = arith.maximumf %59, %60 : vector<8x1xf32>
    %cst_26 = arith.constant 1.000000e+00 : f32
    %62 = vector.broadcast %cst_26 : f32 to vector<8x1xf32>
    %63 = arith.divf %62, %61 : vector<8x1xf32>
    %64 = vector.broadcast %63 : vector<8x1xf32> to vector<8x128xf32>
    %65 = arith.mulf %54, %64 : vector<8x128xf32>
    %cst_27 = arith.constant -4.480000e+02 : f32
    %cst_28 = arith.constant 4.480000e+02 : f32
    %66 = vector.broadcast %cst_27 : f32 to vector<8x128xf32>
    %67 = arith.maximumf %66, %65 : vector<8x128xf32>
    %68 = vector.broadcast %cst_28 : f32 to vector<8x128xf32>
    %69 = arith.minimumf %68, %67 : vector<8x128xf32>
    %70 = arith.truncf %69 : vector<8x128xf32> to vector<8x128xbf16>
    %cst_29 = arith.constant dense<0.000000e+00> : vector<8x128xf32>
    %71 = tpu.matmul %70, %6, %cst_29 {dimension_numbers = #tpu.dot_dimension_numbers<[1], [0], [0], [1], [0, 0, 1, 1], [], []>} : vector<8x128xbf16>, vector<128x128xbf16>, vector<8x128xf32> -> vector<8x128xf32>
    %72 = vector.broadcast %4 : f32 to vector<8x1xf32>
    %73 = arith.mulf %61, %72 : vector<8x1xf32>
    %74 = vector.broadcast %73 : vector<8x1xf32> to vector<8x128xf32>
    %75 = arith.mulf %71, %74 : vector<8x128xf32>
    %76 = arith.addf %75, %42 : vector<8x128xf32>
    %77 = arith.mulf %76, %76 : vector<8x128xf32>
    %cst_30 = arith.constant dense<0.000000e+00> : vector<8xf32>
    %78 = vector.multi_reduction <add>, %77, %cst_30 [1] : vector<8x128xf32> to vector<8xf32>
    %79 = vector.shape_cast %78 : vector<8xf32> to vector<8x1xf32>
    %cst_31 = arith.constant 1.280000e+02 : f32
    %80 = vector.broadcast %cst_31 : f32 to vector<8x1xf32>
    %81 = arith.divf %79, %80 : vector<8x1xf32>
    %cst_32 = arith.constant 9.99999997E-7 : f32
    %82 = vector.broadcast %cst_32 : f32 to vector<8x1xf32>
    %83 = arith.addf %81, %82 : vector<8x1xf32>
    %84 = math.rsqrt %83 : vector<8x1xf32>
    %85 = vector.broadcast %84 : vector<8x1xf32> to vector<8x128xf32>
    %86 = arith.mulf %76, %85 : vector<8x128xf32>
    %87 = vector.broadcast %2 : vector<1x128xf32> to vector<8x128xf32>
    %88 = arith.mulf %86, %87 : vector<8x128xf32>
    %c0_33 = arith.constant 0 : index
    %c0_34 = arith.constant 0 : index
    %89 = vector.load %arg6[%c0_33, %c0_34] : memref<16x128xf32, #tpu.memory_space<vmem>>, vector<8x128xf32>
    tpu.vector_store %arg6[%c0_33, %c0_34], %88 {strides = array<i32>} : memref<16x128xf32, #tpu.memory_space<vmem>>, vector<8x128xf32>,
    %c8 = arith.constant 8 : index
    %c0_35 = arith.constant 0 : index
    %90 = vector.load %arg1[%c8, %c0_35] : memref<16x128xf32, #tpu.memory_space<vmem>>, vector<8x128xf32>
    %91 = math.sqrt %90 : vector<8x128xf32>
    %92 = arith.mulf %90, %90 : vector<8x128xf32>
    %cst_36 = arith.constant dense<0.000000e+00> : vector<8xf32>
    %93 = vector.multi_reduction <add>, %92, %cst_36 [1] : vector<8x128xf32> to vector<8xf32>
    %94 = vector.shape_cast %93 : vector<8xf32> to vector<8x1xf32>
    %cst_37 = arith.constant 1.280000e+02 : f32
    %95 = vector.broadcast %cst_37 : f32 to vector<8x1xf32>
    %96 = arith.divf %94, %95 : vector<8x1xf32>
    %cst_38 = arith.constant 9.99999997E-7 : f32
    %97 = vector.broadcast %cst_38 : f32 to vector<8x1xf32>
    %98 = arith.addf %96, %97 : vector<8x1xf32>
    %99 = math.rsqrt %98 : vector<8x1xf32>
    %100 = vector.broadcast %99 : vector<8x1xf32> to vector<8x128xf32>
    %101 = arith.mulf %90, %100 : vector<8x128xf32>
    %102 = vector.broadcast %0 : vector<1x128xf32> to vector<8x128xf32>
    %103 = arith.mulf %101, %102 : vector<8x128xf32>
    %104 = math.absf %103 : vector<8x128xf32>
    %cst_39 = arith.constant dense<0xFF800000> : vector<8xf32>
    %105 = vector.multi_reduction <maximumf>, %104, %cst_39 [1] : vector<8x128xf32> to vector<8xf32>
    %106 = vector.shape_cast %105 : vector<8xf32> to vector<8x1xf32>
    %cst_40 = arith.constant 0.00223214296 : f32
    %107 = vector.broadcast %cst_40 : f32 to vector<8x1xf32>
    %108 = arith.mulf %106, %107 : vector<8x1xf32>
    %cst_41 = arith.constant 9.99999996E-13 : f32
    %109 = vector.broadcast %cst_41 : f32 to vector<8x1xf32>
    %110 = arith.maximumf %108, %109 : vector<8x1xf32>
    %cst_42 = arith.constant 1.000000e+00 : f32
    %111 = vector.broadcast %cst_42 : f32 to vector<8x1xf32>
    %112 = arith.divf %111, %110 : vector<8x1xf32>
    %113 = vector.broadcast %112 : vector<8x1xf32> to vector<8x128xf32>
    %114 = arith.mulf %103, %113 : vector<8x128xf32>
    %cst_43 = arith.constant -4.480000e+02 : f32
    %cst_44 = arith.constant 4.480000e+02 : f32
    %115 = vector.broadcast %cst_43 : f32 to vector<8x128xf32>
    %116 = arith.maximumf %115, %114 : vector<8x128xf32>
    %117 = vector.broadcast %cst_44 : f32 to vector<8x128xf32>
    %118 = arith.minimumf %117, %116 : vector<8x128xf32>
    %119 = arith.truncf %118 : vector<8x128xf32> to vector<8x128xbf16>
    %cst_45 = arith.constant dense<0.000000e+00> : vector<8x128xf32>
    %120 = tpu.matmul %119, %5, %cst_45 {dimension_numbers = #tpu.dot_dimension_numbers<[1], [0], [0], [1], [0, 0, 1, 1], [], []>} : vector<8x128xbf16>, vector<128x128xbf16>, vector<8x128xf32> -> vector<8x128xf32>
    %121 = vector.broadcast %3 : f32 to vector<8x1xf32>
    %122 = arith.mulf %110, %121 : vector<8x1xf32>
    %123 = vector.broadcast %122 : vector<8x1xf32> to vector<8x128xf32>
    %124 = arith.mulf %120, %123 : vector<8x128xf32>
    %125 = arith.addf %124, %91 : vector<8x128xf32>
    %126 = arith.mulf %125, %125 : vector<8x128xf32>
    %cst_46 = arith.constant dense<0.000000e+00> : vector<8xf32>
    %127 = vector.multi_reduction <add>, %126, %cst_46 [1] : vector<8x128xf32> to vector<8xf32>
    %128 = vector.shape_cast %127 : vector<8xf32> to vector<8x1xf32>
    %cst_47 = arith.constant 1.280000e+02 : f32
    %129 = vector.broadcast %cst_47 : f32 to vector<8x1xf32>
    %130 = arith.divf %128, %129 : vector<8x1xf32>
    %cst_48 = arith.constant 9.99999997E-7 : f32
    %131 = vector.broadcast %cst_48 : f32 to vector<8x1xf32>
    %132 = arith.addf %130, %131 : vector<8x1xf32>
    %133 = math.rsqrt %132 : vector<8x1xf32>
    %134 = vector.broadcast %133 : vector<8x1xf32> to vector<8x128xf32>
    %135 = arith.mulf %125, %134 : vector<8x128xf32>
    %136 = vector.broadcast %1 : vector<1x128xf32> to vector<8x128xf32>
    %137 = arith.mulf %135, %136 : vector<8x128xf32>
    %138 = math.absf %137 : vector<8x128xf32>
    %cst_49 = arith.constant dense<0xFF800000> : vector<8xf32>
    %139 = vector.multi_reduction <maximumf>, %138, %cst_49 [1] : vector<8x128xf32> to vector<8xf32>
    %140 = vector.shape_cast %139 : vector<8xf32> to vector<8x1xf32>
    %cst_50 = arith.constant 0.00223214296 : f32
    %141 = vector.broadcast %cst_50 : f32 to vector<8x1xf32>
    %142 = arith.mulf %140, %141 : vector<8x1xf32>
    %cst_51 = arith.constant 9.99999996E-13 : f32
    %143 = vector.broadcast %cst_51 : f32 to vector<8x1xf32>
    %144 = arith.maximumf %142, %143 : vector<8x1xf32>
    %cst_52 = arith.constant 1.000000e+00 : f32
    %145 = vector.broadcast %cst_52 : f32 to vector<8x1xf32>
    %146 = arith.divf %145, %144 : vector<8x1xf32>
    %147 = vector.broadcast %146 : vector<8x1xf32> to vector<8x128xf32>
    %148 = arith.mulf %137, %147 : vector<8x128xf32>
    %cst_53 = arith.constant -4.480000e+02 : f32
    %cst_54 = arith.constant 4.480000e+02 : f32
    %149 = vector.broadcast %cst_53 : f32 to vector<8x128xf32>
    %150 = arith.maximumf %149, %148 : vector<8x128xf32>
    %151 = vector.broadcast %cst_54 : f32 to vector<8x128xf32>
    %152 = arith.minimumf %151, %150 : vector<8x128xf32>
    %153 = arith.truncf %152 : vector<8x128xf32> to vector<8x128xbf16>
    %cst_55 = arith.constant dense<0.000000e+00> : vector<8x128xf32>
    %154 = tpu.matmul %153, %6, %cst_55 {dimension_numbers = #tpu.dot_dimension_numbers<[1], [0], [0], [1], [0, 0, 1, 1], [], []>} : vector<8x128xbf16>, vector<128x128xbf16>, vector<8x128xf32> -> vector<8x128xf32>
    %155 = vector.broadcast %4 : f32 to vector<8x1xf32>
    %156 = arith.mulf %144, %155 : vector<8x1xf32>
    %157 = vector.broadcast %156 : vector<8x1xf32> to vector<8x128xf32>
    %158 = arith.mulf %154, %157 : vector<8x128xf32>
    %159 = arith.addf %158, %125 : vector<8x128xf32>
    %160 = arith.mulf %159, %159 : vector<8x128xf32>
    %cst_56 = arith.constant dense<0.000000e+00> : vector<8xf32>
    %161 = vector.multi_reduction <add>, %160, %cst_56 [1] : vector<8x128xf32> to vector<8xf32>
    %162 = vector.shape_cast %161 : vector<8xf32> to vector<8x1xf32>
    %cst_57 = arith.constant 1.280000e+02 : f32
    %163 = vector.broadcast %cst_57 : f32 to vector<8x1xf32>
    %164 = arith.divf %162, %163 : vector<8x1xf32>
    %cst_58 = arith.constant 9.99999997E-7 : f32
    %165 = vector.broadcast %cst_58 : f32 to vector<8x1xf32>
    %166 = arith.addf %164, %165 : vector<8x1xf32>
    %167 = math.rsqrt %166 : vector<8x1xf32>
    %168 = vector.broadcast %167 : vector<8x1xf32> to vector<8x128xf32>
    %169 = arith.mulf %159, %168 : vector<8x128xf32>
    %170 = vector.broadcast %2 : vector<1x128xf32> to vector<8x128xf32>
    %171 = arith.mulf %169, %170 : vector<8x128xf32>
    %c8_59 = arith.constant 8 : index
    %c0_60 = arith.constant 0 : index
    %172 = vector.load %arg6[%c8_59, %c0_60] : memref<16x128xf32, #tpu.memory_space<vmem>>, vector<8x128xf32>
    tpu.vector_store %arg6[%c8_59, %c0_60], %171 {strides = array<i32>} : memref<16x128xf32, #tpu.memory_space<vmem>>, vector<8x128xf32>,
    return
  }
  func.func @transform_0(%arg0: i32) -> (i32, i32) {
    %c0_i32 = arith.constant 0 : i32
    %c0_i32_0 = arith.constant 0 : i32
    return %arg0, %c0_i32 : i32, i32
  }
  func.func @transform_1(%arg0: i32) -> (i32, i32) {
    %c0_i32 = arith.constant 0 : i32
    %c0_i32_0 = arith.constant 0 : i32
    %c0_i32_1 = arith.constant 0 : i32
    return %c0_i32, %c0_i32_0 : i32, i32
  }
  func.func @transform_2(%arg0: i32) -> (i32, i32) {
    %c0_i32 = arith.constant 0 : i32
    %c0_i32_0 = arith.constant 0 : i32
    %c0_i32_1 = arith.constant 0 : i32
    return %c0_i32, %c0_i32_0 : i32, i32
  }
  func.func @transform_3(%arg0: i32) -> (i32, i32) {
    %c0_i32 = arith.constant 0 : i32
    %c0_i32_0 = arith.constant 0 : i32
    %c0_i32_1 = arith.constant 0 : i32
    return %c0_i32, %c0_i32_0 : i32, i32
  }
  func.func @transform_4(%arg0: i32) -> i32 {
    %c0_i32 = arith.constant 0 : i32
    %c0_i32_0 = arith.constant 0 : i32
    return %c0_i32 : i32
  }
  func.func @transform_5(%arg0: i32) -> (i32, i32) {
    %c0_i32 = arith.constant 0 : i32
    %c0_i32_0 = arith.constant 0 : i32
    return %arg0, %c0_i32 : i32, i32
  }
}

</mosaic_0001>

<bundles_post_ra>
// kernel: tpu_custom_call.1
= control target key start
LH: loop header
LB: loop body
LE: loop exit
PB: predicated region body
PF: predicated region fallthrough
CT: control target
= control target key end

     0   :  { %10 = vsyncpa [#allocation3], 0  ;;  %s1054_s0 = inlined_call_operand.hbm [shape: f32[16,128], index: 0, kind: input, shape index: {}]   ;;  %s1055_s1 = inlined_call_operand.hbm [shape: f32[3,128], index: 1, kind: input, shape index: {}]   ;;  %s1056_s2 = inlined_call_operand.hbm [shape: bf16[128,128], index: 2, kind: input, shape index: {}]   ;;  %s1057_s3 = inlined_call_operand.hbm [shape: bf16[128,128], index: 3, kind: input, shape index: {}]   ;;  %s1058_s4 = inlined_call_operand.vmem [shape: f32[2], index: 4, kind: input, shape index: {}]   ;;  %s1059_s5 = inlined_call_operand.hbm [shape: f32[16,128], index: 5, kind: output, shape index: {}]  }
   0x1   :  { %11 = vsyncpa [#allocation7], 0 }
   0x2   :  { %12 = vsyncpa [#allocation10], 0 }
   0x3   :  { %13 = vsyncpa [#allocation5], 0 }
   0x4   :  { %14 = vsyncpa [#allocation4], 0  ;;  %s862_s18 = smov [#allocation6]   ;;  %s863_s20 = smov [#allocation2]  }
   0x5   :  { %s33_s19 = sshll.u32 %s862_s18, 4  ;;  %s20_s21 = sshll.u32 %s863_s20, 4  ;;  %s34_s19 = int_to_ptr.vmem [resolvable:$true] %s33_s19  ;;  %s904_s21 = int_to_ptr.vmem [resolvable:$true] %s20_s21 }
   0x6   :  { %s730_s24 = scalar_lea.hbm %s1055_s1, 64 }
   0x7   :  { %p731_p0 = scmp.ne.s32.totalorder %s1055_s1, %s730_s24  ;;  %p734_p1 = scmp.lt.u32.totalorder %s730_s24, %s1055_s1 }
   0x9   :  { %p736_p2 = pnand %p734_p1, %p731_p0 }
   0xb   :  { %739 = shalt.err (!%p736_p2)
}
   0xc   :  { %s740_s29 = scalar_lea.vmem %s34_s19, 64  ;;  %p745_p4 = scmp.lt.s32.totalorder %s34_s19, %s34_s19 }
   0xd   :  { %p741_p3 = scmp.ne.s32.totalorder %s34_s19, %s740_s29  ;;  %p746_p5 = scmp.lt.s32.totalorder %s740_s29, %s740_s29 }
   0xf   :  { %p747_p6 = por %p746_p5, %p745_p4 }
  0x11   :  { %p748_p7 = pnand %p747_p6, %p741_p3 }
  0x13   :  { %751 = shalt.err (!%p748_p7)
}
  0x14   :  { %36 = dma.hbm_to_vmem [thread:$0]  %s1055_s1, 64, %s34_s19, [#allocation7]  }
  0x15   :  { %s752_s9 = scalar_lea.hbm %s1054_s0, 256 }
  0x16   :  { %p753_p8 = scmp.ne.s32.totalorder %s1054_s0, %s752_s9  ;;  %p756_p9 = scmp.lt.u32.totalorder %s752_s9, %s1054_s0 }
  0x18   :  { %p758_p10 = pnand %p756_p9, %p753_p8 }
  0x1a   :  { %761 = shalt.err (!%p758_p10)
}
  0x1b   :  { %s762_s14 = scalar_lea.vmem %s904_s21, 256  ;;  %p767_p12 = scmp.lt.s32.totalorder %s904_s21, %s904_s21 }
  0x1c   :  { %p763_p11 = scmp.ne.s32.totalorder %s904_s21, %s762_s14  ;;  %p768_p13 = scmp.lt.s32.totalorder %s762_s14, %s762_s14 }
  0x1e   :  { %p769_p0 = por %p768_p13, %p767_p12 }
  0x20   :  { %p770_p1 = pnand %p769_p0, %p763_p11 }
  0x22   :  { %773 = shalt.err (!%p770_p1)
}
  0x23   :  { %s864_s1 = smov 128   ;;  %s865_s15 = smov 8  }
  0x24   :  { %26 = dma.hbm_to_vmem [thread:$0]  %s1054_s0, 256, %s904_s21, [#allocation3], %s864_s1, %s864_s1, %s865_s15  }
  0x25   :  { %s866_s18 = smov [#allocation8]   ;;  %s774_s23 = scalar_lea.hbm %s1056_s2, 1024 }
  0x26   :  { %s42_s19 = sshll.u32 %s866_s18, 4  ;;  %p775_p2 = scmp.ne.s32.totalorder %s1056_s2, %s774_s23  ;;  %s43_s19 = int_to_ptr.vmem [resolvable:$true] %s42_s19 }
  0x27   :  { %p778_p3 = scmp.lt.u32.totalorder %s774_s23, %s1056_s2 }
  0x29   :  { %p780_p4 = pnand %p778_p3, %p775_p2 }
  0x2b   :  { %783 = shalt.err (!%p780_p4)
}
  0x2c   :  { %s784_s28 = scalar_lea.vmem %s43_s19, 1024  ;;  %p789_p6 = scmp.lt.s32.totalorder %s43_s19, %s43_s19 }
  0x2d   :  { %p785_p5 = scmp.ne.s32.totalorder %s43_s19, %s784_s28  ;;  %p790_p7 = scmp.lt.s32.totalorder %s784_s28, %s784_s28 }
  0x2f   :  { %p791_p8 = por %p790_p7, %p789_p6 }
  0x31   :  { %p792_p9 = pnand %p791_p8, %p785_p5 }
  0x33   :  { %795 = shalt.err (!%p792_p9)
}
  0x34   :  { %s867_s0 = smov 64   ;;  %s868_s21 = smov 4  }
  0x35   :  { %48 = dma.hbm_to_vmem [thread:$0]  %s1056_s2, 1024, %s43_s19, [#allocation7], %s867_s0, %s867_s0, %s868_s21  }
  0x36   :  { %s869_s6 = smov [#allocation9]   ;;  %s67_s10 = sshll.u32 %s1058_s4, 4  ;;  %s68_s10 = int_to_ptr.vmem [resolvable:$true] %s67_s10 }
  0x37   :  { %s54_s7 = sshll.u32 %s869_s6, 4  ;;  %s796_s13 = scalar_lea.hbm %s1057_s3, 1024  ;;  %s55_s7 = int_to_ptr.vmem [resolvable:$true] %s54_s7 }
  0x38   :  { %p797_p10 = scmp.ne.s32.totalorder %s1057_s3, %s796_s13  ;;  %p800_p11 = scmp.lt.u32.totalorder %s796_s13, %s1057_s3 }
  0x3a   :  { %p802_p12 = pnand %p800_p11, %p797_p10 }
  0x3c   :  { %805 = shalt.err (!%p802_p12)
}
  0x3d   :  { %s806_s2 = scalar_lea.vmem %s55_s7, 1024  ;;  %p811_p0 = scmp.lt.s32.totalorder %s55_s7, %s55_s7 }
  0x3e   :  { %p807_p13 = scmp.ne.s32.totalorder %s55_s7, %s806_s2  ;;  %p812_p1 = scmp.lt.s32.totalorder %s806_s2, %s806_s2 }
  0x40   :  { %p813_p2 = por %p812_p1, %p811_p0 }
  0x42   :  { %p814_p3 = pnand %p813_p2, %p807_p13 }
  0x44   :  { %817 = shalt.err (!%p814_p3)
}
  0x45   :  { %60 = dma.hbm_to_vmem [thread:$0]  %s1057_s3, 1024, %s55_s7, [#allocation10], %s867_s0, %s867_s0, %s868_s21  }
  0x46   :  { %s818_s20 = scalar_lea.vmem %s68_s10, 16  ;;  %p823_p5 = scmp.lt.s32.totalorder %s68_s10, %s68_s10 }
  0x47   :  { %p819_p4 = scmp.ne.s32.totalorder %s68_s10, %s818_s20  ;;  %p824_p6 = scmp.lt.s32.totalorder %s818_s20, %s818_s20 }
  0x49   :  { %p825_p7 = por %p824_p6, %p823_p5 }
  0x4b   :  { %p826_p8 = pnand %p825_p7, %p819_p4 }
  0x4d   :  { %829 = shalt.err (!%p826_p8)
}
  0x4e   :  { %s870_s22 = smov [#allocation11]  }
  0x4f   :  { %70 = dma.vmem_to_smem %s68_s10, 16, %s870_s22, [#allocation5]  }
  0x50   :  { %852 = dma.done.wait [#allocation3], 256  }
  0x51   :  { %853 = vsyncadd [#allocation3], 4294967040 }
  0x52   :  { %854 = dma.done.wait [#allocation7], 1088  }
  0x53   :  { %855 = vsyncadd [#allocation7], 4294966208 }
  0x54   :  { %856 = dma.done.wait [#allocation10], 1024  }
  0x55   :  { %857 = vsyncadd [#allocation10], 4294966272 }
  0x56   :  { %858 = dma.done.wait [#allocation5], 16  }
  0x57   :  { %859 = vsyncadd [#allocation5], 4294967280 }
  0x58   :  { %86 = sfence }
  0x59   :  { %v965_v0 = vld [vmem:[#allocation2] sm:$0xff]  ;;  %v967_v1 = vld [vmem:[#allocation2 + $0x8] sm:$0xff]  ;;  %v690_v4 = vld [vmem:[#allocation8] sm:$0xff]   ;;  %v871_v5 = vmov 0.0   ;;  %vm872_vm0 = vmmov 0   ;;  %s91_s3 = sld [smem:[#allocation11]] }
  0x5a   :  { %v133_v2 = vmul.f32 %v965_v0, %v965_v0  ;;  %v385_v3 = vmul.f32 %v967_v1, %v967_v1  ;;  %598 = vmatprep.subr.bf16.mxu0 %v871_v5  ;;  %618 = vmatprep.subr.bf16.mxu1 %v871_v5  ;;  %v691_v6 = vld [vmem:[#allocation8 + $0x8] sm:$0xff]   ;;  %v692_v7 = vld [vmem:[#allocation8 + $0x10] sm:$0xff]   ;;  %v539_v15 = vld [vmem:[#allocation6] ss:$0 sm:$0xff]  ;;  %vm128_vm1 = vcmp.eq.f32.partialorder %v965_v0, inf  ;;  %v131_v44 = vand.u32 2147483648, %v965_v0 }
  0x5b   :  { %599 = vmatpush3.bf16.msra.mxu0 %v690_v4  ;;  %v693_v23 = vld [vmem:[#allocation8 + $0x18] sm:$0xff]   ;;  %v694_v24 = vld [vmem:[#allocation8 + $0x20] sm:$0xff]   ;;  %v695_v25 = vld [vmem:[#allocation8 + $0x28] sm:$0xff]   ;;  %614 = vmatprep.mubr.msk.bf16.mxu0 %vm872_vm0, %v871_v5  ;;  %vm130_vm2 = vcmp.eq.f32.partialorder %v965_v0, 0.0  ;;  %vm380_vm3 = vcmp.eq.f32.partialorder %v967_v1, inf  ;;  %v383_v58 = vand.u32 2147483648, %v967_v1 }
  0x5c   :  { %134 = vadd.xlane.f32.xlu0 %v133_v2  ;;  %600 = vmatprep.subr.bf16.mxu0 %v871_v5  ;;  %v696_v26 = vld [vmem:[#allocation8 + $0x30] sm:$0xff]   ;;  %v697_v27 = vld [vmem:[#allocation8 + $0x38] sm:$0xff]   ;;  %vm382_vm4 = vcmp.eq.f32.partialorder %v967_v1, 0.0  ;;  %s538_s23 = sld [smem:[#allocation11 + $0x1]]  ;;  %s873_s24 = smov [#allocation12]  }
  0x5d   :  { %634 = vmatprep.mubr.msk.bf16.mxu1 %vm872_vm0, %v871_v5  ;;  %s523_s25 = sshll.u32 %s873_s24, 4  ;;  %s524_s25 = int_to_ptr.vmem [resolvable:$true] %s523_s25 }
  0x5e   :  { %s830_s26 = scalar_lea.vmem %s524_s25, 256  ;;  %p835_p10 = scmp.lt.s32.totalorder %s524_s25, %s524_s25 }
  0x5f   :  { %601 = vmatpush3.bf16.msra.mxu0 %v691_v6  ;;  %v245_v45 = vstv %s91_s3  ;;  %p831_p9 = scmp.ne.s32.totalorder %s524_s25, %s830_s26  ;;  %p836_p11 = scmp.lt.s32.totalorder %s830_s26, %s830_s26 }
  0x60   :  { %386 = vadd.xlane.f32.xlu0 %v385_v3  ;;  %602 = vmatprep.subr.bf16.mxu0 %v871_v5 }
  0x61   :  { %p837_p12 = por %p836_p11, %p835_p10 }
  0x63   :  { %603 = vmatpush3.bf16.msra.mxu0 %v692_v7  ;;  %p838_p13 = pnand %p837_p12, %p831_p9 }
  0x64   :  { %604 = vmatprep.subr.bf16.mxu0 %v871_v5 }
  0x67   :  { %605 = vmatpush3.bf16.msra.mxu0 %v693_v23 }
  0x68   :  { %606 = vmatprep.subr.bf16.mxu0 %v871_v5 }
  0x6b   :  { %607 = vmatpush3.bf16.msra.mxu0 %v694_v24 }
  0x6c   :  { %608 = vmatprep.subr.bf16.mxu0 %v871_v5 }
  0x6f   :  { %609 = vmatpush3.bf16.msra.mxu0 %v695_v25 }
  0x70   :  { %610 = vmatprep.subr.bf16.mxu0 %v871_v5 }
  0x73   :  { %611 = vmatpush3.bf16.msra.mxu0 %v696_v26 }
  0x74   :  { %612 = vmatprep.subr.bf16.mxu0 %v871_v5 }
  0x77   :  { %613 = vmatpush3.bf16.msra.mxu0 %v697_v27 }
  0x78   :  { %638 = vmatprep.subr.bf16.mxu0 %v871_v5 }
  0xe9   :  { %v135_v8 = vpop.xlane.xlu0 %134 }
  0xea   :  { %v137_v9 = vmul.f32 0.0078125, %v135_v8  ;;  %v699_v8 = vld [vmem:[#allocation9 + $0x8] sm:$0xff]  }
  0xec   :  { %v138_v10 = vadd.f32 1e-06, %v137_v9 }
  0xed   :  { %v387_v11 = vpop.xlane.xlu0 %386 }
  0xee   :  { %706 = vrsqrt.f32 %v138_v10  ;;  %v388_v12 = vmul.f32 0.0078125, %v387_v11 }
  0xf0   :  { %v389_v13 = vadd.f32 1e-06, %v388_v12 }
  0xf2   :  { %708 = vrsqrt.f32 %v389_v13  ;;  %v549_v13 = vld [vmem:[#allocation6 + $0x1] ss:$0 sm:$0xff] }
  0xf8   :  { %v707_v14 = vpop.eup %706 }
  0xf9   :  { %v140_v16 = vmul.f32 %v707_v14, %v965_v0 }
  0xfb   :  { %v145_v17 = vmul.f32 %v539_v15, %v140_v16 }
  0xfc   :  { %v709_v18 = vpop.eup %708 }
  0xfd   :  { %v146_v19 = vand.u32 2147483647, %v145_v17  ;;  %v391_v20 = vmul.f32 %v709_v18, %v967_v1 }
  0xff   :  { %147 = vmax.xlane.f32.xlu1 %v146_v19  ;;  %v392_v21 = vmul.f32 %v539_v15, %v391_v20  ;;  %v701_v20 = vld [vmem:[#allocation9 + $0x18] sm:$0xff]  }
 0x101   :  { %v393_v22 = vand.u32 2147483647, %v392_v21 }
 0x103   :  { %394 = vmax.xlane.f32.xlu1 %v393_v22  ;;  %v703_v22 = vld [vmem:[#allocation9 + $0x28] sm:$0xff]  }
 0x18c   :  { %v148_v28 = vpop.xlane.xlu1 %147 }
 0x18d   :  { %v149_v29 = vmul.f32 0.002232143, %v148_v28 }
 0x18f   :  { %v150_v30 = vmax.f32 %v149_v29, 1e-12 }
 0x190   :  { %v395_v34 = vpop.xlane.xlu1 %394 }
 0x191   :  { %710 = vrcp.f32 %v150_v30  ;;  %v396_v36 = vmul.f32 0.002232143, %v395_v34  ;;  %v246_v47 = vmul.f32 %v245_v45, %v150_v30 }
 0x193   :  { %v397_v37 = vmax.f32 %v396_v36, 1e-12 }
 0x195   :  { %712 = vrcp.f32 %v397_v37  ;;  %v444_v60 = vmul.f32 %v397_v37, %v245_v45 }
 0x196   :  { %714 = vrsqrt.f32 %v965_v0 }
 0x197   :  { %716 = vrsqrt.f32 %v967_v1 }
 0x19b   :  { %v711_v31 = vpop.eup %710 }
 0x19c   :  { %v153_v32 = vmul.f32 %v711_v31, %v145_v17 }
 0x19e   :  { %v540_v33 = vclamps-f32 %v153_v32, 448.0 }
 0x19f   :  { %v713_v38 = vpop.eup %712 }
 0x1a0   :  { %v156_v35 = vpack.c.bf16 %v540_v33, %v540_v33  ;;  %v400_v39 = vmul.f32 %v713_v38, %v392_v21  ;;  %v715_v42 = vpop.eup %714  ;;  %v702_v21 = vld [vmem:[#allocation9 + $0x20] sm:$0xff]  }
 0x1a1   :  { %v127_v43 = vmul.f32 %v715_v42, %v965_v0  ;;  %v717_v56 = vpop.eup %716 }
 0x1a2   :  { %615 = vmatmul.mubr.bf16.vlgmr.msra.gmra.mrb[0].mxu0 %v156_v35  ;;  %v560_v40 = vclamps-f32 %v400_v39, 448.0  ;;  %v379_v57 = vmul.f32 %v717_v56, %v967_v1 }
 0x1a3   :  { %639 = vmatpush3.bf16.msra.mxu0 %v690_v4  ;;  %654 = vmatprep.mubr.msk.bf16.mxu0 %vm872_vm0, %v871_v5  ;;  %v129_v46 = vsel %vm128_vm1, %v965_v0, %v127_v43  ;;  %v360_v43 = vstv %s538_s23 }
 0x1a4   :  { %640 = vmatprep.subr.bf16.mxu0 %v871_v5  ;;  %v403_v41 = vpack.c.bf16 %v560_v40, %v560_v40  ;;  %v132_v48 = vsel %vm130_vm2, %v131_v44, %v129_v46  ;;  %v381_v59 = vsel %vm380_vm3, %v967_v1, %v379_v57  ;;  %v700_v1 = vld [vmem:[#allocation9 + $0x10] sm:$0xff]  }
 0x1a5   :  { %v384_v61 = vsel %vm382_vm4, %v383_v58, %v381_v59 }
 0x1a7   :  { %641 = vmatpush3.bf16.msra.mxu0 %v691_v6 }
 0x1a8   :  { %642 = vmatprep.subr.bf16.mxu0 %v871_v5 }
 0x1ab   :  { %643 = vmatpush3.bf16.msra.mxu0 %v692_v7  ;;  %v698_v7 = vld [vmem:[#allocation9] sm:$0xff]  }
 0x1ac   :  { %644 = vmatprep.subr.bf16.mxu0 %v871_v5  ;;  %619 = vmatpush3.bf16.msra.mxu1 %v698_v7 }
 0x1ad   :  { %620 = vmatprep.subr.bf16.mxu1 %v871_v5 }
 0x1af   :  { %645 = vmatpush3.bf16.msra.mxu0 %v693_v23  ;;  %v704_v23 = vld [vmem:[#allocation9 + $0x30] sm:$0xff]  }
 0x1b0   :  { %646 = vmatprep.subr.bf16.mxu0 %v871_v5  ;;  %621 = vmatpush3.bf16.msra.mxu1 %v699_v8 }
 0x1b1   :  { %622 = vmatprep.subr.bf16.mxu1 %v871_v5 }
 0x1b3   :  { %647 = vmatpush3.bf16.msra.mxu0 %v694_v24 }
 0x1b4   :  { %648 = vmatprep.subr.bf16.mxu0 %v871_v5  ;;  %623 = vmatpush3.bf16.msra.mxu1 %v700_v1 }
 0x1b5   :  { %624 = vmatprep.subr.bf16.mxu1 %v871_v5 }
 0x1b7   :  { %649 = vmatpush3.bf16.msra.mxu0 %v695_v25 }
 0x1b8   :  { %650 = vmatprep.subr.bf16.mxu0 %v871_v5  ;;  %625 = vmatpush3.bf16.msra.mxu1 %v701_v20 }
 0x1b9   :  { %626 = vmatprep.subr.bf16.mxu1 %v871_v5 }
 0x1bb   :  { %651 = vmatpush3.bf16.msra.mxu0 %v696_v26 }
 0x1bc   :  { %652 = vmatprep.subr.bf16.mxu0 %v871_v5  ;;  %627 = vmatpush3.bf16.msra.mxu1 %v702_v21 }
 0x1bd   :  { %628 = vmatprep.subr.bf16.mxu1 %v871_v5 }
 0x1bf   :  { %653 = vmatpush3.bf16.msra.mxu0 %v697_v27  ;;  %v705_v27 = vld [vmem:[#allocation9 + $0x38] sm:$0xff]  }
 0x1c0   :  { %629 = vmatpush3.bf16.msra.mxu1 %v703_v22 }
 0x1c1   :  { %630 = vmatprep.subr.bf16.mxu1 %v871_v5 }
 0x1c2   :  { %655 = vmatmul.mubr.bf16.vlgmr.msra.gmra.mrb[4].mxu0 %v403_v41 }
 0x1c4   :  { %631 = vmatpush3.bf16.msra.mxu1 %v704_v23 }
 0x1c5   :  { %632 = vmatprep.subr.bf16.mxu1 %v871_v5 }
 0x1c8   :  { %633 = vmatpush3.bf16.msra.mxu1 %v705_v27 }
 0x1c9   :  { %658 = vmatprep.subr.bf16.mxu1 %v871_v5 }
 0x275   :  { %v239_v49 = vpop.f32.mrb[0].mxu0 }
 0x276   :  { %v247_v50 = vmul.f32 %v246_v47, %v239_v49  ;;  %v616_v51 = vpop.f32.mrb[1].mxu0 }
 0x277   :  { %v242_v52 = vpop.f32.mrb[2].mxu0 }
 0x278   :  { %v1004_v53 = vadd.f32 %v247_v50, %v132_v48  ;;  %v617_v54 = vpop.f32.mrb[3].mxu0 }
 0x27a   :  { %v249_v55 = vmul.f32 %v1004_v53, %v1004_v53 }
 0x27c   :  { %250 = vadd.xlane.f32.xlu0 %v249_v55 }
 0x295   :  { %v438_v62 = vpop.f32.mrb[4].mxu0 }
 0x296   :  { %v445_v63 = vmul.f32 %v444_v60, %v438_v62  ;;  %v656_v0 = vpop.f32.mrb[5].mxu0 }
 0x297   :  { %v441_v2 = vpop.f32.mrb[6].mxu0  ;;  %v559_v0 = vld [vmem:[#allocation6 + $0x2] ss:$0 sm:$0xff] }
 0x298   :  { %v1014_v3 = vadd.f32 %v445_v63, %v384_v61  ;;  %v657_v4 = vpop.f32.mrb[7].mxu0 }
 0x29a   :  { %v447_v6 = vmul.f32 %v1014_v3, %v1014_v3 }
 0x29c   :  { %448 = vadd.xlane.f32.xlu1 %v447_v6 }
 0x309   :  { %v251_v9 = vpop.xlane.xlu0 %250 }
 0x30a   :  { %v252_v10 = vmul.f32 0.0078125, %v251_v9 }
 0x30c   :  { %v253_v11 = vadd.f32 1e-06, %v252_v10 }
 0x30e   :  { %718 = vrsqrt.f32 %v253_v11 }
 0x318   :  { %v719_v12 = vpop.eup %718 }
 0x319   :  { %v255_v14 = vmul.f32 %v719_v12, %v1004_v53 }
 0x31b   :  { %v260_v15 = vmul.f32 %v549_v13, %v255_v14 }
 0x31d   :  { %v261_v16 = vand.u32 2147483647, %v260_v15 }
 0x31f   :  { %262 = vmax.xlane.f32.xlu0 %v261_v16 }
 0x329   :  { %v449_v17 = vpop.xlane.xlu1 %448 }
 0x32a   :  { %v450_v18 = vmul.f32 0.0078125, %v449_v17 }
 0x32c   :  { %v451_v19 = vadd.f32 1e-06, %v450_v18 }
 0x32e   :  { %720 = vrsqrt.f32 %v451_v19 }
 0x338   :  { %v721_v24 = vpop.eup %720 }
 0x339   :  { %v453_v25 = vmul.f32 %v721_v24, %v1014_v3 }
 0x33b   :  { %v454_v26 = vmul.f32 %v549_v13, %v453_v25 }
 0x33d   :  { %v455_v28 = vand.u32 2147483647, %v454_v26 }
 0x33f   :  { %456 = vmax.xlane.f32.xlu1 %v455_v28 }
 0x3ac   :  { %v263_v29 = vpop.xlane.xlu0 %262 }
 0x3ad   :  { %v264_v30 = vmul.f32 0.002232143, %v263_v29 }
 0x3af   :  { %v265_v31 = vmax.f32 %v264_v30, 1e-12 }
 0x3b1   :  { %722 = vrcp.f32 %v265_v31  ;;  %v361_v44 = vmul.f32 %v360_v43, %v265_v31 }
 0x3bb   :  { %v723_v32 = vpop.eup %722 }
 0x3bc   :  { %v268_v33 = vmul.f32 %v723_v32, %v260_v15 }
 0x3be   :  { %v550_v34 = vclamps-f32 %v268_v33, 448.0 }
 0x3c0   :  { %v271_v35 = vpack.c.bf16 %v550_v34, %v550_v34 }
 0x3c2   :  { %635 = vmatmul.mubr.bf16.vlgmr.msra.gmra.mrb[0].mxu1 %v271_v35 }
 0x3c3   :  { %659 = vmatpush3.bf16.msra.mxu1 %v698_v7  ;;  %674 = vmatprep.mubr.msk.bf16.mxu1 %vm872_vm0, %v871_v5 }
 0x3c4   :  { %660 = vmatprep.subr.bf16.mxu1 %v871_v5 }
 0x3c7   :  { %661 = vmatpush3.bf16.msra.mxu1 %v699_v8 }
 0x3c8   :  { %662 = vmatprep.subr.bf16.mxu1 %v871_v5 }
 0x3cb   :  { %663 = vmatpush3.bf16.msra.mxu1 %v700_v1 }
 0x3cc   :  { %v457_v36 = vpop.xlane.xlu1 %456  ;;  %664 = vmatprep.subr.bf16.mxu1 %v871_v5 }
 0x3cd   :  { %v458_v37 = vmul.f32 0.002232143, %v457_v36 }
 0x3cf   :  { %v459_v38 = vmax.f32 %v458_v37, 1e-12  ;;  %665 = vmatpush3.bf16.msra.mxu1 %v701_v20 }
 0x3d0   :  { %666 = vmatprep.subr.bf16.mxu1 %v871_v5 }
 0x3d1   :  { %724 = vrcp.f32 %v459_v38  ;;  %v506_v52 = vmul.f32 %v459_v38, %v360_v43 }
 0x3d3   :  { %667 = vmatpush3.bf16.msra.mxu1 %v702_v21 }
 0x3d4   :  { %668 = vmatprep.subr.bf16.mxu1 %v871_v5 }
 0x3d7   :  { %669 = vmatpush3.bf16.msra.mxu1 %v703_v22 }
 0x3d8   :  { %670 = vmatprep.subr.bf16.mxu1 %v871_v5 }
 0x3db   :  { %v725_v39 = vpop.eup %724  ;;  %671 = vmatpush3.bf16.msra.mxu1 %v704_v23 }
 0x3dc   :  { %672 = vmatprep.subr.bf16.mxu1 %v871_v5  ;;  %v462_v40 = vmul.f32 %v725_v39, %v454_v26 }
 0x3de   :  { %v561_v41 = vclamps-f32 %v462_v40, 448.0 }
 0x3df   :  { %673 = vmatpush3.bf16.msra.mxu1 %v705_v27 }
 0x3e0   :  { %v465_v42 = vpack.c.bf16 %v561_v41, %v561_v41 }
 0x3e2   :  { %675 = vmatmul.mubr.bf16.vlgmr.msra.gmra.mrb[4].mxu1 %v465_v42 }
 0x495   :  { %v354_v45 = vpop.f32.mrb[0].mxu1 }
 0x496   :  { %v362_v46 = vmul.f32 %v361_v44, %v354_v45  ;;  %v636_v47 = vpop.f32.mrb[1].mxu1 }
 0x497   :  { %v357_v48 = vpop.f32.mrb[2].mxu1 }
 0x498   :  { %v363_v49 = vadd.f32 %v362_v46, %v1004_v53  ;;  %v637_v50 = vpop.f32.mrb[3].mxu1 }
 0x49a   :  { %v364_v51 = vmul.f32 %v363_v49, %v363_v49 }
 0x49c   :  { %365 = vadd.xlane.f32.xlu0 %v364_v51 }
 0x4b5   :  { %v500_v54 = vpop.f32.mrb[4].mxu1 }
 0x4b6   :  { %v507_v5 = vmul.f32 %v506_v52, %v500_v54  ;;  %v676_v55 = vpop.f32.mrb[5].mxu1 }
 0x4b7   :  { %v503_v56 = vpop.f32.mrb[6].mxu1 }
 0x4b8   :  { %v508_v57 = vadd.f32 %v507_v5, %v1014_v3  ;;  %v677_v58 = vpop.f32.mrb[7].mxu1 }
 0x4ba   :  { %v509_v59 = vmul.f32 %v508_v57, %v508_v57 }
 0x4bc   :  { %510 = vadd.xlane.f32.xlu1 %v509_v59 }
 0x529   :  { %v366_v60 = vpop.xlane.xlu0 %365 }
 0x52a   :  { %v367_v61 = vmul.f32 0.0078125, %v366_v60 }
 0x52c   :  { %v368_v62 = vadd.f32 1e-06, %v367_v61 }
 0x52e   :  { %726 = vrsqrt.f32 %v368_v62 }
 0x538   :  { %v727_v63 = vpop.eup %726 }
 0x539   :  { %v370_v53 = vmul.f32 %v727_v63, %v363_v49 }
 0x53b   :  { %v375_v2 = vmul.f32 %v559_v0, %v370_v53 }
 0x53d   :  { %376 = vst [vmem:[#allocation12] sm:$0xff] %v375_v2 }
 0x549   :  { %v511_v4 = vpop.xlane.xlu1 %510 }
 0x54a   :  { %v512_v6 = vmul.f32 0.0078125, %v511_v4 }
 0x54c   :  { %v513_v7 = vadd.f32 1e-06, %v512_v6 }
 0x54e   :  { %728 = vrsqrt.f32 %v513_v7 }
 0x558   :  { %v729_v8 = vpop.eup %728 }
 0x559   :  { %v515_v3 = vmul.f32 %v729_v8, %v508_v57 }
 0x55b   :  { %v516_v1 = vmul.f32 %v559_v0, %v515_v3 }
 0x55d   :  { %517 = vst [vmem:[#allocation12 + $0x8] sm:$0xff] %v516_v1 }
 0x55e   :  { %841 = shalt.err (!%p838_p13)
}
 0x55f   :  { %s842_s0 = scalar_lea.hbm %s1059_s5, 256 }
 0x560   :  { %p843_p0 = scmp.ne.s32.totalorder %s1059_s5, %s842_s0  ;;  %p846_p1 = scmp.lt.u32.totalorder %s842_s0, %s1059_s5 }
 0x562   :  { %p848_p2 = pnand %p846_p1, %p843_p0 }
 0x564   :  { %851 = shalt.err (!%p848_p2)
}
 0x565   :  { %529 = dma.vmem_to_hbm [thread:$0]  %s524_s25, 256, %s1059_s5, [#allocation4], %s864_s1, %s864_s1, %s865_s15  }
 0x566   :  { %860 = dma.done.wait [#allocation4], 256  }
 0x567   :  { %861 = vsyncadd [#allocation4], 4294967040 }
 0x568   :  { %533 = vsyncpa [#allocation3], 1 }
 0x569   :  { %534 = vsyncpa [#allocation7], 1 }
 0x56a   :  { %535 = vsyncpa [#allocation10], 1 }
 0x56b   :  { %536 = vsyncpa [#allocation4], 1 }
 0x56c   :  { %537 = vsyncpa [#allocation5], 1 }

</bundles_post_ra>
